<compile_context>
chip_gen: v5e
topology: v5e:2x2
jax: 0.10.0
libtpu: 0.0.40
codegen_flags: <defaults>
</compile_context>

<pallas_src>
import jax
import jax.numpy as jnp
from jax import lax
from jax.experimental import pallas as pl
from jax.experimental.pallas import tpu as pltpu


def residual_linear_kernel(x_ref, w_ref, b_ref, xres_ref, o_ref):
    """One (j, i) grid step: o = x_strip @ W_strip^T + b + x_tile.

    x_ref    : (tm, H_in)  activation row strip   (block index (i, 0); resident across j? no,
                                                   but never re-fetched for a reduction axis)
    w_ref    : (tn, H_in)  PyTorch-layout weight  (block index (j, 0); resident across the
                                                   whole inner i sweep -> read once per call)
    b_ref    : (1,  tn)    bias tile              (block index (0, j))
    xres_ref : (tm, tn)    residual tile of x     (block index (i, j))
    o_ref    : (tm, tn)    output tile            (block index (i, j))
    """
    # Full H_in contraction on the MXU with an f32 accumulator.  The weight is
    # contracted in its native PyTorch (H_out, H_in) layout, i.e. x @ W^T, so no
    # wrapper-side transpose (and no extra HBM round trip) is needed.
    acc = lax.dot_general(
        x_ref[...],
        w_ref[...],
        dimension_numbers=(((1,), (1,)), ((), ())),
        preferred_element_type=jnp.float32,
    )
    acc = acc + b_ref[...].astype(jnp.float32)      # bias     (added once)
    acc = acc + xres_ref[...].astype(jnp.float32)   # residual (added once)
    o_ref[...] = acc.astype(o_ref.dtype)


def _vmem_working_set_bytes(tm, tn, h_in, in_itemsize, out_itemsize):
    """Bytes Pallas keeps live (double-buffered) for one grid step."""
    per_buf = (
        tm * h_in * in_itemsize      # x row strip (matmul view)
        + tn * h_in * in_itemsize    # weight strip
        + tm * tn * in_itemsize      # residual x tile
        + tn * in_itemsize           # bias tile
        + tm * tn * out_itemsize     # output tile
    )
    return 2 * per_buf


def residual_forward(x, weight, bias, *, tm=512, tn=512,
                     vmem_budget_bytes=44 * 1024 * 1024):
    """out = x @ weight.T + bias + x   (Residual(Linear) forward).

    x:      (N, H)          activations (f32 or bf16)
    weight: (H_out, H_in)   PyTorch Linear layout (NOT transposed here)
    bias:   (H_out,)
    """
    N, H_in = x.shape
    H_out, H_in_w = weight.shape
    assert H_in == H_in_w, "weight in_features must match activation feature dim"
    assert H_out == H_in, "Residual(Linear) requires a square layer"
    assert H_in % 128 == 0, "feature dim must be lane-dense (multiple of 128)"
    assert N % 8 == 0, "row dim must be a multiple of the sublane tile (8)"

    # Clamp tiles to the problem size; shapes must tile evenly (pad externally
    # if they don't — keeps stores full-width, unmasked vst).
    tm = min(tm, N)
    tn = min(tn, H_out)
    assert N % tm == 0 and H_out % tn == 0, (
        "shapes must be divisible by the chosen tiles"
    )

    in_item = jnp.dtype(x.dtype).itemsize
    out_item = in_item
    # Shrink tiles until the double-buffered working set fits the VMEM budget.
    # The default budget (~44 MiB) is chosen so the same plan is valid on
    # v7x (64 MiB physical) as well as v5e/v6e (128 MiB).
    while _vmem_working_set_bytes(tm, tn, H_in, in_item, out_item) > vmem_budget_bytes:
        if tm >= tn and tm > 8 and tm % 2 == 0 and N % (tm // 2) == 0:
            tm //= 2
        elif tn > 128 and tn % 2 == 0 and H_out % (tn // 2) == 0:
            tn //= 2
        elif tm > 8 and tm % 2 == 0 and N % (tm // 2) == 0:
            tm //= 2
        else:
            break  # best effort; vmem_limit below is raised to match

    est = _vmem_working_set_bytes(tm, tn, H_in, in_item, out_item)
    vmem_limit = int(min(max(2 * est, 32 * 1024 * 1024), 96 * 1024 * 1024))

    b2 = bias.reshape(1, H_out)
    J, I = H_out // tn, N // tm
    grid = (J, I)  # leading axis j: weight strip resident across the i sweep

    w_item = jnp.dtype(weight.dtype).itemsize
    b_item = jnp.dtype(bias.dtype).itemsize
    cost = pl.CostEstimate(
        flops=2 * N * H_in * H_out,
        transcendentals=0,
        bytes_accessed=(
            J * N * H_in * in_item        # x matmul strips (re-read once per j)
            + H_out * H_in * w_item       # W read exactly once
            + N * H_out * in_item         # residual view of x (one pass)
            + H_out * b_item              # bias
            + N * H_out * out_item        # output writeback
        ),
    )

    return pl.pallas_call(
        residual_linear_kernel,
        out_shape=jax.ShapeDtypeStruct((N, H_out), x.dtype),
        grid_spec=pltpu.PrefetchScalarGridSpec(
            num_scalar_prefetch=0,
            grid=grid,
            in_specs=[
                pl.BlockSpec((tm, H_in), lambda j, i: (i, 0)),   # x, full-H strip
                pl.BlockSpec((tn, H_in), lambda j, i: (j, 0)),   # W, read once per j
                pl.BlockSpec((1, tn),    lambda j, i: (0, j)),   # bias
                pl.BlockSpec((tm, tn),   lambda j, i: (i, j)),   # x (residual view)
            ],
            out_specs=pl.BlockSpec((tm, tn), lambda j, i: (i, j)),
        ),
        compiler_params=pltpu.CompilerParams(
            dimension_semantics=("parallel", "parallel"),
            vmem_limit_bytes=vmem_limit,
        ),
        cost_estimate=cost,
    )(x, weight, b2, x)


if __name__ == "__main__":
    key = jax.random.PRNGKey(0)
    k_x, k_w, k_b = jax.random.split(key, 3)

    # Small but lane-dense shapes (feature dim a multiple of 128).
    batch, hidden = 128, 256
    x = jax.random.normal(k_x, (batch, hidden), dtype=jnp.float32)

    # Deterministic synthetic PyTorch-Linear parameters:
    #   weight: (out_features, in_features), bias: (out_features,)
    bound = 1.0 / jnp.sqrt(hidden)
    weight = jax.random.uniform(
        k_w, (hidden, hidden), minval=-bound, maxval=bound, dtype=jnp.float32
    )
    bias = jax.random.uniform(
        k_b, (hidden,), minval=-bound, maxval=bound, dtype=jnp.float32
    )

    # Small tiles so the demo exercises a multi-block (j, i) grid with an even
    # leading parallel axis: grid = (2, 1) -> both v7x TensorCores get work.
    out = residual_forward(x, weight, bias, tm=128, tn=128)
    out = jax.block_until_ready(out)

    # Pure-JAX reference: Residual(Linear).forward
    ref = x @ weight.T + bias + x
    assert out.shape == ref.shape
    err = jnp.max(jnp.abs(out - ref))
    assert jnp.allclose(out, ref, atol=1e-3, rtol=1e-3), (
        f"mismatch vs reference, max abs err = {err}"
    )

    print("KERNEL_OK")
</pallas_src>

<mosaic_0001>
module attributes {stable_mosaic.version = 11 : i64} {
  func.func @residual_linear_kernel(%arg0: i32, %arg1: i32, %arg2: memref<128x256xf32, #tpu.memory_space<vmem>>, %arg3: memref<128x256xf32, #tpu.memory_space<vmem>>, %arg4: memref<1x128xf32, #tpu.memory_space<vmem>>, %arg5: memref<128x128xf32, #tpu.memory_space<vmem>>, %arg6: memref<128x128xf32, #tpu.memory_space<vmem>>) attributes {dimension_semantics = [#tpu.dimension_semantics<parallel>, #tpu.dimension_semantics<parallel>], iteration_bounds = array<i64: 2, 1>, scalar_prefetch = 0 : i64, scratch_operands = 0 : i64, tpu.core_type = #tpu.core_type<tc>, window_params = [{transform_indices = @transform_0, window_bounds = array<i64: 128, 256>}, {transform_indices = @transform_1, window_bounds = array<i64: 128, 256>}, {transform_indices = @transform_2, window_bounds = array<i64: 1, 128>}, {transform_indices = @transform_3, window_bounds = array<i64: 128, 128>}, {transform_indices = @transform_4, window_bounds = array<i64: 128, 128>}]} {
    %c0 = arith.constant 0 : index
    %c0_0 = arith.constant 0 : index
    %0 = vector.load %arg2[%c0, %c0_0] : memref<128x256xf32, #tpu.memory_space<vmem>>, vector<128x256xf32>
    %c0_1 = arith.constant 0 : index
    %c0_2 = arith.constant 0 : index
    %1 = vector.load %arg3[%c0_1, %c0_2] : memref<128x256xf32, #tpu.memory_space<vmem>>, vector<128x256xf32>
    %cst = arith.constant dense<0.000000e+00> : vector<128x128xf32>
    %2 = tpu.matmul %0, %1, %cst {dimension_numbers = #tpu.dot_dimension_numbers<[1], [1], [0], [0], [0, 0, 1, 0], [], []>} : vector<128x256xf32>, vector<128x256xf32>, vector<128x128xf32> -> vector<128x128xf32>
    %c0_3 = arith.constant 0 : index
    %c0_4 = arith.constant 0 : index
    %3 = vector.load %arg4[%c0_3, %c0_4] : memref<1x128xf32, #tpu.memory_space<vmem>>, vector<1x128xf32>
    %4 = vector.broadcast %3 : vector<1x128xf32> to vector<128x128xf32>
    %5 = arith.addf %2, %4 : vector<128x128xf32>
    %c0_5 = arith.constant 0 : index
    %c0_6 = arith.constant 0 : index
    %6 = vector.load %arg5[%c0_5, %c0_6] : memref<128x128xf32, #tpu.memory_space<vmem>>, vector<128x128xf32>
    %7 = arith.addf %5, %6 : vector<128x128xf32>
    %c0_7 = arith.constant 0 : index
    %c0_8 = arith.constant 0 : index
    %8 = vector.load %arg6[%c0_7, %c0_8] : memref<128x128xf32, #tpu.memory_space<vmem>>, vector<128x128xf32>
    tpu.vector_store %arg6[%c0_7, %c0_8], %7 {strides = array<i32>} : memref<128x128xf32, #tpu.memory_space<vmem>>, vector<128x128xf32>,
    return
  }
  func.func @transform_0(%arg0: i32, %arg1: i32) -> (i32, i32) {
    %c0_i32 = arith.constant 0 : i32
    %c0_i32_0 = arith.constant 0 : i32
    return %arg1, %c0_i32 : i32, i32
  }
  func.func @transform_1(%arg0: i32, %arg1: i32) -> (i32, i32) {
    %c0_i32 = arith.constant 0 : i32
    %c0_i32_0 = arith.constant 0 : i32
    return %arg0, %c0_i32 : i32, i32
  }
  func.func @transform_2(%arg0: i32, %arg1: i32) -> (i32, i32) {
    %c0_i32 = arith.constant 0 : i32
    %c0_i32_0 = arith.constant 0 : i32
    return %c0_i32, %arg0 : i32, i32
  }
  func.func @transform_3(%arg0: i32, %arg1: i32) -> (i32, i32) {
    %c0_i32 = arith.constant 0 : i32
    return %arg1, %arg0 : i32, i32
  }
  func.func @transform_4(%arg0: i32, %arg1: i32) -> (i32, i32) {
    %c0_i32 = arith.constant 0 : i32
    return %arg1, %arg0 : i32, i32
  }
}

</mosaic_0001>

<bundles_post_ra>
// kernel: tpu_custom_call.1
= control target key start
LH: loop header
LB: loop body
LE: loop exit
PB: predicated region body
PF: predicated region fallthrough
CT: control target
= control target key end

     0   :  { %s1420_s0 = inlined_call_operand.hbm [shape: f32[128,256], index: 0, kind: input, shape index: {}]   ;;  %s1421_s1 = inlined_call_operand.hbm [shape: f32[256,256], index: 1, kind: input, shape index: {}]   ;;  %s1422_s2 = inlined_call_operand.hbm [shape: f32[1,256], index: 2, kind: input, shape index: {}]   ;;  %s1423_s3 = inlined_call_operand.hbm [shape: f32[128,256], index: 3, kind: input, shape index: {}]   ;;  %s1424_s4 = inlined_call_operand.hbm [shape: f32[128,256], index: 4, kind: output, shape index: {}]  }
   0x1   :  { %1431 = sst [smem:[#allocation19_spill]] %s1420_s0 }
   0x2   :  { %1432 = sst [smem:[#allocation20_spill]] %s1421_s1 }
   0x3   :  { %1433 = sst [smem:[#allocation21_spill]] %s1422_s2 }
   0x4   :  { %9 = vsyncpa [#allocation3], 0 }
   0x5   :  { %10 = vsyncpa [#allocation6], 0 }
   0x6   :  { %12 = vsyncpa [#allocation6 + $0x1], 0 }
   0x7   :  { %13 = vsyncpa [#allocation9], 0 }
   0x8   :  { %15 = vsyncpa [#allocation9 + $0x1], 0 }
   0x9   :  { %16 = vsyncpa [#allocation4], 0 }
   0xa   :  { %18 = vsyncpa [#allocation4 + $0x1], 0  ;;  %s1133_s15 = smov 0   ;;  %s1135_s16 = smov 0  }
   0xb   :  { %s1137_s17 = smov 0   ;;  %s1139_s18 = smov 0  }
   0xc   :  { %s1141_s19 = smov 0   ;;  %s1143_s20 = smov 0  }
   0xd LB: > { %1434 = sst [smem:[#allocation15_spill]] %s1086_s17  ;;  %s36_s21 = sadd.s32 1, %s1094_s19  ;;  %s1098_s20 = sphi %s1143_s20, %s24_s20   ;;  %s1094_s19 = sphi %s1141_s19, %s1456_s19   ;;  %s1090_s18 = sphi %s1139_s18, %s1455_s18   ;;  %s1086_s17 = sphi %s1137_s17, %s1454_s17   ;;  %s1082_s16 = sphi %s1135_s16, %s1453_s16   ;;  %s1078_s15 = sphi %s1133_s15, %s1452_s15  }
   0xe   : > { %1435 = sst [smem:[#allocation16_spill]] %s1098_s20  ;;  %s69_s22 = sadd.s32 1, %s1086_s17 }
   0xf   : > { %p38_p0 = scmp.ge.s32.totalorder %s36_s21, 2  ;;  %p76_p1 = scmp.ne.s32.totalorder %s1086_s17, %s1082_s16 }
  0x10   : > { %p77_p2 = scmp.eq.s32.totalorder %s1098_s20, 0  ;;  %p747_p4 = scmp.ge.s32.totalorder %s1098_s20, 2 }
  0x11   : > { %s1458_s21 = smov (%p38_p0, %s36_s21), 0  ;;  %p828_p6 = scmp.lt.s32.totalorder %s1098_s20, 2 }
  0x12   : > { %1436 = sst [smem:[#allocation17_spill]] %s1458_s21  ;;  %p1173_p3 = por %p77_p2, %p76_p1 }
  0x13   : > { %s66_s24 = ssub.s32 %s1094_s19, %s1458_s21  ;;  %s206_s25 = sand.u32 1, %s1098_s20  }
  0x14   : > { %p67_p5 = scmp.eq.s32.totalorder %s66_s24, 0  ;;  %s1183_s26 = sand.u32 1, %s1086_s17  }
  0x15   : > { %s748_s28 = sshll.u32 %s1183_s26, 8  ;;  %s764_s29 = sshll.u32 %s1094_s19, 8 }
  0x16   : > { %s1186_s27 = scalar_select %p67_p5, %s1086_s17, %s69_s22  }
  0x17   : > { %s1439_s1 = sld [smem:[#allocation20_spill]]  ;;  %s210_s7 = scalar_lea.vmem [#allocation5], %s748_s28 }
  0x18   : > { %1438 = sst [smem:[#allocation18_spill]] %s1186_s27  ;;  %s219_s8 = sshll.u32 %s210_s7, 4  ;;  %s220_s8 = int_to_ptr.vmem [resolvable:$true] %s219_s8 }
  0x19   : > { %p1195_p7 = pnand %p828_p6, %p1173_p3  ;;  %s1199_s11 = scalar_lea.sflag [#allocation6], %s206_s25 }
  0x1a   : > { %s1425_s12 = smov 256   ;;  %s1101_s13 = smov 16  }
  0x1b   : > { %s1208_s14 = sadd.s32 4294967295, %s1098_s20   ;;  %s744_s22 = sadd.s32 4294967294, %s1098_s20  }
  0x1c   : > { %p82_p8 = scmp.ne.s32.totalorder %s1082_s16, %s1078_s15  ;;  %p83_p9 = scmp.eq.s32.totalorder %s1208_s14, 0 }
  0x1d   : > { %s216_s6 = scalar_lea.hbm %s1439_s1, %s764_s29  ;;  %p162_p10 = scmp.eq.s32.totalorder %s1208_s14, 1 }
  0x1e   : > { %s217_s9 = sshll.u32 %s216_s6, 4  ;;  %p168_p11 = scmp.eq.s32.totalorder %s744_s22, 1  ;;  %s218_s9 = int_to_ptr.hbm [resolvable:$true] %s217_s9 }
  0x1f   : > { %816 = dma.hbm_to_vmem [thread:$0]  (!%p1195_p7), %s218_s9, 4096, %s220_s8, %s1199_s11, %s1425_s12, %s1425_s12, %s1101_s13  }
  0x20   : > { %p745_p12 = scmp.ge.s32.totalorder %s1098_s20, 1  ;;  %p1218_p13 = por %p83_p9, %p82_p8 }
  0x21   : > { %p1225_p0 = por %p162_p10, %p76_p1  ;;  %p1229_p2 = por %p168_p11, %p82_p8 }
  0x22   : > { %p175_p3 = scmp.lt.s32.totalorder %s1098_s20, 3  ;;  %s1444_s0 = sld [smem:[#allocation19_spill]] }
  0x23   : > { %s1102_s6 = smov [#allocation2]   ;;  %s1446_s2 = sld [smem:[#allocation21_spill]] }
  0x24   : > { %p1237_p5 = pnand %p745_p12, %p175_p3  ;;  %s192_s7 = sshll.u32 %s1102_s6, 4  ;;  %s193_s7 = int_to_ptr.vmem [resolvable:$true] %s192_s7 }
  0x25   : > { %s232_s29 = scalar_lea.vmem [#allocation7], %s1183_s26  ;;  %s752_s6 = sshll.u32 %s1183_s26, 7 }
  0x26   : > { %p809_p1 = pneg %p1237_p5  ;;  %s239_s12 = sshll.u32 %s232_s29, 4  ;;  %s240_s12 = int_to_ptr.vmem [resolvable:$true] %s239_s12 }
  0x27   : > { %s753_s1 = sshll.u32 %s1094_s19, 3  ;;  %s247_s17 = scalar_lea.sflag [#allocation9], %s1183_s26 }
  0x28   : > { %s190_s30 = sshll.u32 %s1444_s0, 4  ;;  %p810_p6 = pnand %p809_p1, %p83_p9  ;;  %s191_s30 = int_to_ptr.hbm [resolvable:$true] %s190_s30 }
  0x29   : > { %s235_s22 = scalar_lea.hbm %s1446_s2, %s1094_s19  ;;  %s1447_s0 = smov 256  }
  0x2a   : > { %s237_s28 = sshll.u32 %s235_s22, 4  ;;  %s257_s9 = scalar_lea.hbm %s1423_s3, %s753_s1  ;;  %s238_s28 = int_to_ptr.hbm [resolvable:$true] %s237_s28 }
  0x2b   : > { %812 = dma.hbm_to_vmem [thread:$0]  (!%p810_p6), %s191_s30, 4096, %s193_s7, [#allocation3], %s1447_s0, %s1447_s0, %s1101_s13  }
  0x2c   : > { %819 = dma.hbm_to_vmem [thread:$0]  (!%p1195_p7), %s238_s28, 16, %s240_s12, %s1199_s11  }
  0x2d   : > { %s250_s2 = scalar_lea.vmem [#allocation8], %s752_s6  ;;  %s258_s22 = sshll.u32 %s257_s9, 4  ;;  %s259_s22 = int_to_ptr.hbm [resolvable:$true] %s258_s22 }
  0x2e   : > { %s260_s27 = sshll.u32 %s250_s2, 4  ;;  %s1103_s29 = smov 128   ;;  %s261_s27 = int_to_ptr.vmem [resolvable:$true] %s260_s27 }
  0x2f   : > { %s1104_s20 = smov 8   ;;  %272 = sbr.rel (%p1237_p5) target bundleno = 323 (0x143), region = 36 }
  0x30   : > { %822 = dma.hbm_to_vmem [thread:$0]  (!%p1195_p7), %s259_s22, 2048, %s261_s27, %s247_s17, %s1447_s0, %s1103_s29, %s1104_s20  }
  0x34   : > { %1061 = dma.done.wait (%p83_p9), [#allocation3], 4096  }
  0x35   : > { %1063 = vsyncadd (%p83_p9), [#allocation3], 4294963200  ;;  %s279_s1 = sand.u32 1, %s1208_s14   ;;  %s1273_s2 = sand.u32 1, %s1082_s16  }
  0x36   : > { %s756_s21 = sshll.u32 %s1273_s2, 8  ;;  %s280_s26 = scalar_lea.sflag [#allocation6], %s279_s1 }
  0x37   : > { %s1276_s10 = scalar_lea.vmem [#allocation5], %s756_s21 }
  0x38   : > { %1065 = dma.done.wait (%p1218_p13), %s280_s26, 4112  }
  0x39   : > { %1067 = vsyncadd (%p1218_p13), %s280_s26, 4294963184  ;;  %s757_s0 = sshll.u32 %s1273_s2, 7  ;;  %s292_s17 = scalar_lea.vmem [#allocation7], %s1273_s2 }
  0x3a   : > { %s299_s20 = scalar_lea.sflag [#allocation9], %s1273_s2  ;;  %s1287_s27 = scalar_lea.vmem [#allocation8], %s757_s0 }
  0x3b   : > { %1069 = dma.done.wait (%p1218_p13), %s299_s20, 2048  }
  0x3c   : > { %1071 = vsyncadd (%p1218_p13), %s299_s20, 4294965248  ;;  %v403_v0 = vld [vmem:[%s1276_s10 + $0xf0] sm:$0xff]  ;;  %v404_v1 = vld [vmem:[%s1276_s10 + $0xf8] sm:$0xff]  ;;  %s1334_s11 = scalar_lea.vmem [#allocation10], %s757_s0  ;;  %s760_s12 = sshll.u32 %s1090_s18, 3 }
  0x3d   : > { %765 = vmatpush.xpose.msra.mxu2 %v403_v0  ;;  %781 = vmatpush.xpose.msra.mxu3 %v404_v1  ;;  %v401_v2 = vld [vmem:[%s1276_s10 + $0xe0] sm:$0xff]  ;;  %v402_v3 = vld [vmem:[%s1276_s10 + $0xe8] sm:$0xff]  ;;  %v399_v4 = vld [vmem:[%s1276_s10 + $0xd0] sm:$0xff]  ;;  %s601_s23 = scalar_lea.hbm %s1424_s4, %s760_s12  ;;  %s602_s30 = sshll.u32 %s1334_s11, 4  ;;  %s603_s30 = int_to_ptr.vmem [resolvable:$true] %s602_s30 }
  0x3e   : > { %409 = vmatpush.xpose.msra.mxu0 %v403_v0  ;;  %474 = vmatpush.xpose.msra.mxu1 %v404_v1  ;;  %v400_v5 = vld [vmem:[%s1276_s10 + $0xd8] sm:$0xff]  ;;  %v397_v6 = vld [vmem:[%s1276_s10 + $0xc0] sm:$0xff]  ;;  %v398_v7 = vld [vmem:[%s1276_s10 + $0xc8] sm:$0xff]  ;;  %s604_s18 = sshll.u32 %s601_s23, 4  ;;  %s588_s5 = scalar_lea.sflag [#allocation4], %s1273_s2  ;;  %s605_s18 = int_to_ptr.hbm [resolvable:$true] %s604_s18 }
  0x3f   : > { %v395_v8 = vld [vmem:[%s1276_s10 + $0xb0] sm:$0xff]  ;;  %v396_v9 = vld [vmem:[%s1276_s10 + $0xb8] sm:$0xff]  ;;  %v393_v10 = vld [vmem:[%s1276_s10 + $0xa0] sm:$0xff]  ;;  %s1022_s7 = sshra.s32 %s605_s18, 4  ;;  %s1028_s9 = scalar_lea.hbm %s1424_s4, 256  ;;  %s1023_s7 = int_to_ptr.hbm [resolvable:$true] %s1022_s7 }
  0x40   : > { %v394_v11 = vld [vmem:[%s1276_s10 + $0xa8] sm:$0xff]  ;;  %v391_v12 = vld [vmem:[%s1276_s10 + $0x90] sm:$0xff]  ;;  %v392_v13 = vld [vmem:[%s1276_s10 + $0x98] sm:$0xff]  ;;  %s1024_s28 = scalar_lea.hbm %s1023_s7, 128  ;;  %p1029_p10 = scmp.lt.s32.totalorder %s1023_s7, %s1424_s4 }
  0x41   : > { %766 = vmatpush.xpose.msra.mxu2 %v401_v2  ;;  %782 = vmatpush.xpose.msra.mxu3 %v402_v3  ;;  %v389_v14 = vld [vmem:[%s1276_s10 + $0x80] sm:$0xff]  ;;  %v390_v15 = vld [vmem:[%s1276_s10 + $0x88] sm:$0xff]  ;;  %v387_v16 = vld [vmem:[%s1276_s10 + $0x70] sm:$0xff]  ;;  %p1025_p7 = scmp.ne.s32.totalorder %s1023_s7, %s1024_s28  ;;  %p1030_p11 = scmp.lt.s32.totalorder %s1028_s9, %s1024_s28 }
  0x42   : > { %410 = vmatpush.xpose.msra.mxu0 %v401_v2  ;;  %475 = vmatpush.xpose.msra.mxu1 %v402_v3  ;;  %v388_v17 = vld [vmem:[%s1276_s10 + $0x78] sm:$0xff]  ;;  %v385_v18 = vld [vmem:[%s1276_s10 + $0x60] sm:$0xff]  ;;  %v386_v19 = vld [vmem:[%s1276_s10 + $0x68] sm:$0xff] }
  0x43   : > { %v383_v20 = vld [vmem:[%s1276_s10 + $0x50] sm:$0xff]  ;;  %v384_v21 = vld [vmem:[%s1276_s10 + $0x58] sm:$0xff]  ;;  %v381_v22 = vld [vmem:[%s1276_s10 + $0x40] sm:$0xff]  ;;  %p1026_p8 = pnand %p1025_p7, %p1225_p0  ;;  %p1031_p12 = por %p1030_p11, %p1029_p10 }
  0x44   : > { %v382_v23 = vld [vmem:[%s1276_s10 + $0x48] sm:$0xff]  ;;  %v379_v24 = vld [vmem:[%s1276_s10 + $0x30] sm:$0xff]  ;;  %v380_v25 = vld [vmem:[%s1276_s10 + $0x38] sm:$0xff] }
  0x45   : > { %767 = vmatpush.xpose.msra.mxu2 %v399_v4  ;;  %783 = vmatpush.xpose.msra.mxu3 %v400_v5  ;;  %v377_v26 = vld [vmem:[%s1276_s10 + $0x20] sm:$0xff]  ;;  %v378_v27 = vld [vmem:[%s1276_s10 + $0x28] sm:$0xff]  ;;  %v375_v28 = vld [vmem:[%s1276_s10 + $0x10] sm:$0xff]  ;;  %p1027_p9 = pneg %p1026_p8 }
  0x46   : > { %411 = vmatpush.xpose.msra.mxu0 %v399_v4  ;;  %476 = vmatpush.xpose.msra.mxu1 %v400_v5  ;;  %v376_v29 = vld [vmem:[%s1276_s10 + $0x18] sm:$0xff]  ;;  %v373_v30 = vld [vmem:[%s1276_s10] sm:$0xff]  ;;  %v374_v31 = vld [vmem:[%s1276_s10 + $0x8] sm:$0xff] }
  0x47   : > { %v357_v32 = vld [vmem:[#allocation2 + $0x80] sm:$0xff]  ;;  %v358_v33 = vld [vmem:[#allocation2 + $0x88] sm:$0xff]  ;;  %v359_v36 = vld [vmem:[#allocation2 + $0x90] sm:$0xff]  ;;  %p1032_p13 = pnand %p1031_p12, %p1027_p9 }
  0x48   : > { %v341_v34 = vld [vmem:[#allocation2] sm:$0xff]  ;;  %v342_v35 = vld [vmem:[#allocation2 + $0x8] sm:$0xff]  ;;  %v360_v37 = vld [vmem:[#allocation2 + $0x98] sm:$0xff] }
  0x49   : > { %768 = vmatpush.xpose.msra.mxu2 %v397_v6  ;;  %784 = vmatpush.xpose.msra.mxu3 %v398_v7  ;;  %v343_v38 = vld [vmem:[#allocation2 + $0x10] sm:$0xff]  ;;  %v344_v39 = vld [vmem:[#allocation2 + $0x18] sm:$0xff]  ;;  %v361_v40 = vld [vmem:[#allocation2 + $0xa0] sm:$0xff] }
  0x4a   : > { %412 = vmatpush.xpose.msra.mxu0 %v397_v6  ;;  %477 = vmatpush.xpose.msra.mxu1 %v398_v7  ;;  %v362_v41 = vld [vmem:[#allocation2 + $0xa8] sm:$0xff]  ;;  %v345_v42 = vld [vmem:[#allocation2 + $0x20] sm:$0xff]  ;;  %v363_v44 = vld [vmem:[#allocation2 + $0xb0] sm:$0xff] }
  0x4b   : > { %v346_v43 = vld [vmem:[#allocation2 + $0x28] sm:$0xff]  ;;  %v364_v45 = vld [vmem:[#allocation2 + $0xb8] sm:$0xff]  ;;  %v347_v46 = vld [vmem:[#allocation2 + $0x30] sm:$0xff] }
  0x4c   : > { %v348_v47 = vld [vmem:[#allocation2 + $0x38] sm:$0xff]  ;;  %v365_v48 = vld [vmem:[#allocation2 + $0xc0] sm:$0xff]  ;;  %v366_v49 = vld [vmem:[#allocation2 + $0xc8] sm:$0xff] }
  0x4d   : > { %769 = vmatpush.xpose.msra.mxu2 %v395_v8  ;;  %785 = vmatpush.xpose.msra.mxu3 %v396_v9  ;;  %v349_v50 = vld [vmem:[#allocation2 + $0x40] sm:$0xff]  ;;  %v350_v51 = vld [vmem:[#allocation2 + $0x48] sm:$0xff]  ;;  %v367_v52 = vld [vmem:[#allocation2 + $0xd0] sm:$0xff] }
  0x4e   : > { %413 = vmatpush.xpose.msra.mxu0 %v395_v8  ;;  %478 = vmatpush.xpose.msra.mxu1 %v396_v9  ;;  %v368_v53 = vld [vmem:[#allocation2 + $0xd8] sm:$0xff]  ;;  %v351_v54 = vld [vmem:[#allocation2 + $0x50] sm:$0xff]  ;;  %v369_v56 = vld [vmem:[#allocation2 + $0xe0] sm:$0xff] }
  0x4f   : > { %v352_v55 = vld [vmem:[#allocation2 + $0x58] sm:$0xff]  ;;  %v370_v57 = vld [vmem:[#allocation2 + $0xe8] sm:$0xff]  ;;  %v353_v58 = vld [vmem:[#allocation2 + $0x60] sm:$0xff] }
  0x50   : > { %v354_v59 = vld [vmem:[#allocation2 + $0x68] sm:$0xff]  ;;  %v371_v60 = vld [vmem:[#allocation2 + $0xf0] sm:$0xff]  ;;  %v372_v61 = vld [vmem:[#allocation2 + $0xf8] sm:$0xff] }
  0x51   : > { %770 = vmatpush.xpose.msra.mxu2 %v393_v10  ;;  %786 = vmatpush.xpose.msra.mxu3 %v394_v11  ;;  %v355_v62 = vld [vmem:[#allocation2 + $0x70] sm:$0xff]  ;;  %v356_v63 = vld [vmem:[#allocation2 + $0x78] sm:$0xff]  ;;  %v1327_v0 = vld [vmem:[%s292_s17] ss:$0 sm:$0xff] }
  0x52   : > { %414 = vmatpush.xpose.msra.mxu0 %v393_v10  ;;  %479 = vmatpush.xpose.msra.mxu1 %v394_v11  ;;  %v539_v4 = vld [vmem:[%s1287_s27] sm:$0xff] }
  0x53   : > { %v547_v10 = vld [vmem:[%s1287_s27 + $0x40] sm:$0xff] }
  0x55   : > { %771 = vmatpush.xpose.msra.mxu2 %v391_v12  ;;  %787 = vmatpush.xpose.msra.mxu3 %v392_v13 }
  0x56   : > { %415 = vmatpush.xpose.msra.mxu0 %v391_v12  ;;  %480 = vmatpush.xpose.msra.mxu1 %v392_v13 }
  0x59   : > { %772 = vmatpush.xpose.msra.mxu2 %v389_v14  ;;  %788 = vmatpush.xpose.msra.mxu3 %v390_v15 }
  0x5a   : > { %416 = vmatpush.xpose.msra.mxu0 %v389_v14  ;;  %481 = vmatpush.xpose.msra.mxu1 %v390_v15 }
  0x5d   : > { %773 = vmatpush.xpose.msra.mxu2 %v387_v16  ;;  %789 = vmatpush.xpose.msra.mxu3 %v388_v17 }
  0x5e   : > { %417 = vmatpush.xpose.msra.mxu0 %v387_v16  ;;  %482 = vmatpush.xpose.msra.mxu1 %v388_v17  ;;  %v540_v16 = vld [vmem:[%s1287_s27 + $0x8] sm:$0xff] }
  0x61   : > { %774 = vmatpush.xpose.msra.mxu2 %v385_v18  ;;  %790 = vmatpush.xpose.msra.mxu3 %v386_v19 }
  0x62   : > { %418 = vmatpush.xpose.msra.mxu0 %v385_v18  ;;  %483 = vmatpush.xpose.msra.mxu1 %v386_v19 }
  0x65   : > { %775 = vmatpush.xpose.msra.mxu2 %v383_v20  ;;  %791 = vmatpush.xpose.msra.mxu3 %v384_v21 }
  0x66   : > { %419 = vmatpush.xpose.msra.mxu0 %v383_v20  ;;  %484 = vmatpush.xpose.msra.mxu1 %v384_v21 }
  0x69   : > { %776 = vmatpush.xpose.msra.mxu2 %v381_v22  ;;  %792 = vmatpush.xpose.msra.mxu3 %v382_v23 }
  0x6a   : > { %420 = vmatpush.xpose.msra.mxu0 %v381_v22  ;;  %485 = vmatpush.xpose.msra.mxu1 %v382_v23  ;;  %v548_v22 = vld [vmem:[%s1287_s27 + $0x48] sm:$0xff] }
  0x6d   : > { %777 = vmatpush.xpose.msra.mxu2 %v379_v24  ;;  %793 = vmatpush.xpose.msra.mxu3 %v380_v25 }
  0x6e   : > { %421 = vmatpush.xpose.msra.mxu0 %v379_v24  ;;  %486 = vmatpush.xpose.msra.mxu1 %v380_v25 }
  0x71   : > { %778 = vmatpush.xpose.msra.mxu2 %v377_v26  ;;  %794 = vmatpush.xpose.msra.mxu3 %v378_v27 }
  0x72   : > { %422 = vmatpush.xpose.msra.mxu0 %v377_v26  ;;  %487 = vmatpush.xpose.msra.mxu1 %v378_v27 }
  0x75   : > { %779 = vmatpush.xpose.msra.mxu2 %v375_v28  ;;  %795 = vmatpush.xpose.msra.mxu3 %v376_v29 }
  0x76   : > { %423 = vmatpush.xpose.msra.mxu0 %v375_v28  ;;  %488 = vmatpush.xpose.msra.mxu1 %v376_v29  ;;  %v541_v28 = vld [vmem:[%s1287_s27 + $0x10] sm:$0xff] }
  0x79   : > { %780 = vmatpush.xpose.msra.mxu2 %v373_v30  ;;  %796 = vmatpush.xpose.msra.mxu3 %v374_v31 }
  0x7a   : > { %424 = vmatpush.xpose.msra.mxu0 %v373_v30  ;;  %489 = vmatpush.xpose.msra.mxu1 %v374_v31 }
  0x7c   : > { %449 = vmatmul.f32.vlgmr.msra.gmra.mxu2 %v357_v32  ;;  %514 = vmatmul.f32.vlgmr.msra.gmra.mxu3 %v358_v33 }
  0x7d   : > { %425 = vmatmul.f32.vlgmr.msra.gmra.mxu0 %v341_v34  ;;  %490 = vmatmul.f32.vlgmr.msra.gmra.mxu1 %v342_v35  ;;  %v549_v34 = vld [vmem:[%s1287_s27 + $0x50] sm:$0xff] }
  0x84   : > { %452 = vmatmul.f32.gmra.mxu2 %v359_v36  ;;  %517 = vmatmul.f32.gmra.mxu3 %v360_v37 }
  0x85   : > { %428 = vmatmul.f32.gmra.mxu0 %v343_v38  ;;  %493 = vmatmul.f32.gmra.mxu1 %v344_v39 }
  0x8c   : > { %455 = vmatmul.f32.gmra.mxu2 %v361_v40  ;;  %520 = vmatmul.f32.gmra.mxu3 %v362_v41  ;;  %v542_v40 = vld [vmem:[%s1287_s27 + $0x18] sm:$0xff] }
  0x8d   : > { %431 = vmatmul.f32.gmra.mxu0 %v345_v42  ;;  %496 = vmatmul.f32.gmra.mxu1 %v346_v43 }
  0x94   : > { %458 = vmatmul.f32.gmra.mxu2 %v363_v44  ;;  %523 = vmatmul.f32.gmra.mxu3 %v364_v45 }
  0x95   : > { %434 = vmatmul.f32.gmra.mxu0 %v347_v46  ;;  %499 = vmatmul.f32.gmra.mxu1 %v348_v47  ;;  %v550_v46 = vld [vmem:[%s1287_s27 + $0x58] sm:$0xff] }
  0x9c   : > { %461 = vmatmul.f32.gmra.mxu2 %v365_v48  ;;  %526 = vmatmul.f32.gmra.mxu3 %v366_v49 }
  0x9d   : > { %437 = vmatmul.f32.gmra.mxu0 %v349_v50  ;;  %502 = vmatmul.f32.gmra.mxu1 %v350_v51 }
  0xa4   : > { %464 = vmatmul.f32.gmra.mxu2 %v367_v52  ;;  %529 = vmatmul.f32.gmra.mxu3 %v368_v53  ;;  %v543_v52 = vld [vmem:[%s1287_s27 + $0x20] sm:$0xff] }
  0xa5   : > { %440 = vmatmul.f32.gmra.mxu0 %v351_v54  ;;  %505 = vmatmul.f32.gmra.mxu1 %v352_v55 }
  0xac   : > { %467 = vmatmul.f32.gmra.mxu2 %v369_v56  ;;  %532 = vmatmul.f32.gmra.mxu3 %v370_v57 }
  0xad   : > { %443 = vmatmul.f32.gmra.mxu0 %v353_v58  ;;  %508 = vmatmul.f32.gmra.mxu1 %v354_v59  ;;  %v551_v58 = vld [vmem:[%s1287_s27 + $0x60] sm:$0xff] }
  0xb4   : > { %470 = vmatmul.f32.gmra.mxu2 %v371_v60  ;;  %535 = vmatmul.f32.gmra.mxu3 %v372_v61 }
  0xb5   : > { %446 = vmatmul.f32.gmra.mxu0 %v355_v62  ;;  %511 = vmatmul.f32.gmra.mxu1 %v356_v63 }
  0xfa   : > { %v426_v1 = vpop.f32.mrf.mxu0  ;;  %v491_v2 = vpop.f32.mrf.mxu1 }
  0xfb   : > { %v427_v3 = vadd.f32 %v1327_v0, %v426_v1  ;;  %v544_v1 = vld [vmem:[%s1287_s27 + $0x28] sm:$0xff] }
  0xfd   : > { %v492_v5 = vadd.f32 %v491_v2, %v427_v3 }
  0xff   : > { %v450_v6 = vpop.f32.mrf.mxu2  ;;  %v555_v7 = vadd.f32 %v539_v4, %v492_v5  ;;  %v515_v8 = vpop.f32.mrf.mxu3 }
 0x100   : > { %v451_v9 = vadd.f32 %v1327_v0, %v450_v6 }
 0x101   : > { %571 = vst [vmem:[%s1334_s11] sm:$0xff] %v555_v7  ;;  %v552_v7 = vld [vmem:[%s1287_s27 + $0x68] sm:$0xff] }
 0x102   : > { %v516_v11 = vadd.f32 %v515_v8, %v451_v9  ;;  %v429_v12 = vpop.f32.mrf.mxu0  ;;  %v494_v13 = vpop.f32.mrf.mxu1 }
 0x103   : > { %v430_v14 = vadd.f32 %v1327_v0, %v429_v12 }
 0x104   : > { %v563_v15 = vadd.f32 %v547_v10, %v516_v11 }
 0x105   : > { %v495_v17 = vadd.f32 %v494_v13, %v430_v14  ;;  %v545_v13 = vld [vmem:[%s1287_s27 + $0x30] sm:$0xff] }
 0x106   : > { %579 = vst [vmem:[%s1334_s11 + $0x40] sm:$0xff] %v563_v15 }
 0x107   : > { %v453_v18 = vpop.f32.mrf.mxu2  ;;  %v556_v19 = vadd.f32 %v540_v16, %v495_v17  ;;  %v518_v20 = vpop.f32.mrf.mxu3 }
 0x108   : > { %v454_v21 = vadd.f32 %v1327_v0, %v453_v18 }
 0x109   : > { %572 = vst [vmem:[%s1334_s11 + $0x8] sm:$0xff] %v556_v19  ;;  %v553_v19 = vld [vmem:[%s1287_s27 + $0x70] sm:$0xff] }
 0x10a   : > { %v519_v23 = vadd.f32 %v518_v20, %v454_v21  ;;  %v432_v24 = vpop.f32.mrf.mxu0  ;;  %v497_v25 = vpop.f32.mrf.mxu1 }
 0x10b   : > { %v433_v26 = vadd.f32 %v1327_v0, %v432_v24 }
 0x10c   : > { %v564_v27 = vadd.f32 %v548_v22, %v519_v23 }
 0x10d   : > { %v498_v29 = vadd.f32 %v497_v25, %v433_v26  ;;  %v546_v25 = vld [vmem:[%s1287_s27 + $0x38] sm:$0xff] }
 0x10e   : > { %580 = vst [vmem:[%s1334_s11 + $0x48] sm:$0xff] %v564_v27 }
 0x10f   : > { %v456_v30 = vpop.f32.mrf.mxu2  ;;  %v557_v31 = vadd.f32 %v541_v28, %v498_v29  ;;  %v521_v32 = vpop.f32.mrf.mxu3 }
 0x110   : > { %v457_v33 = vadd.f32 %v1327_v0, %v456_v30 }
 0x111   : > { %573 = vst [vmem:[%s1334_s11 + $0x10] sm:$0xff] %v557_v31  ;;  %v554_v31 = vld [vmem:[%s1287_s27 + $0x78] sm:$0xff] }
 0x112   : > { %v522_v35 = vadd.f32 %v521_v32, %v457_v33  ;;  %v435_v36 = vpop.f32.mrf.mxu0  ;;  %v500_v37 = vpop.f32.mrf.mxu1 }
 0x113   : > { %v436_v38 = vadd.f32 %v1327_v0, %v435_v36 }
 0x114   : > { %v565_v39 = vadd.f32 %v549_v34, %v522_v35 }
 0x115   : > { %v501_v41 = vadd.f32 %v500_v37, %v436_v38 }
 0x116   : > { %581 = vst [vmem:[%s1334_s11 + $0x50] sm:$0xff] %v565_v39 }
 0x117   : > { %v459_v42 = vpop.f32.mrf.mxu2  ;;  %v558_v43 = vadd.f32 %v542_v40, %v501_v41  ;;  %v524_v44 = vpop.f32.mrf.mxu3 }
 0x118   : > { %v460_v45 = vadd.f32 %v1327_v0, %v459_v42 }
 0x119   : > { %574 = vst [vmem:[%s1334_s11 + $0x18] sm:$0xff] %v558_v43 }
 0x11a   : > { %v525_v47 = vadd.f32 %v524_v44, %v460_v45  ;;  %v438_v48 = vpop.f32.mrf.mxu0  ;;  %v503_v49 = vpop.f32.mrf.mxu1 }
 0x11b   : > { %v439_v50 = vadd.f32 %v1327_v0, %v438_v48 }
 0x11c   : > { %v566_v51 = vadd.f32 %v550_v46, %v525_v47 }
 0x11d   : > { %v504_v53 = vadd.f32 %v503_v49, %v439_v50 }
 0x11e   : > { %582 = vst [vmem:[%s1334_s11 + $0x58] sm:$0xff] %v566_v51 }
 0x11f   : > { %v462_v54 = vpop.f32.mrf.mxu2  ;;  %v559_v55 = vadd.f32 %v543_v52, %v504_v53  ;;  %v527_v56 = vpop.f32.mrf.mxu3 }
 0x120   : > { %v463_v57 = vadd.f32 %v1327_v0, %v462_v54 }
 0x121   : > { %575 = vst [vmem:[%s1334_s11 + $0x20] sm:$0xff] %v559_v55 }
 0x122   : > { %v528_v59 = vadd.f32 %v527_v56, %v463_v57  ;;  %v441_v60 = vpop.f32.mrf.mxu0  ;;  %v506_v61 = vpop.f32.mrf.mxu1 }
 0x123   : > { %v442_v62 = vadd.f32 %v1327_v0, %v441_v60 }
 0x124   : > { %v567_v63 = vadd.f32 %v551_v58, %v528_v59 }
 0x125   : > { %v507_v2 = vadd.f32 %v506_v61, %v442_v62 }
 0x126   : > { %583 = vst [vmem:[%s1334_s11 + $0x60] sm:$0xff] %v567_v63 }
 0x127   : > { %v465_v3 = vpop.f32.mrf.mxu2  ;;  %v560_v4 = vadd.f32 %v544_v1, %v507_v2  ;;  %v530_v5 = vpop.f32.mrf.mxu3 }
 0x128   : > { %v466_v6 = vadd.f32 %v1327_v0, %v465_v3 }
 0x129   : > { %576 = vst [vmem:[%s1334_s11 + $0x28] sm:$0xff] %v560_v4 }
 0x12a   : > { %v531_v8 = vadd.f32 %v530_v5, %v466_v6  ;;  %v444_v9 = vpop.f32.mrf.mxu0  ;;  %v509_v10 = vpop.f32.mrf.mxu1 }
 0x12b   : > { %v445_v11 = vadd.f32 %v1327_v0, %v444_v9 }
 0x12c   : > { %v568_v12 = vadd.f32 %v552_v7, %v531_v8 }
 0x12d   : > { %v510_v14 = vadd.f32 %v509_v10, %v445_v11 }
 0x12e   : > { %584 = vst [vmem:[%s1334_s11 + $0x68] sm:$0xff] %v568_v12 }
 0x12f   : > { %v468_v15 = vpop.f32.mrf.mxu2  ;;  %v561_v16 = vadd.f32 %v545_v13, %v510_v14  ;;  %v533_v17 = vpop.f32.mrf.mxu3 }
 0x130   : > { %v469_v18 = vadd.f32 %v1327_v0, %v468_v15 }
 0x131   : > { %577 = vst [vmem:[%s1334_s11 + $0x30] sm:$0xff] %v561_v16 }
 0x132   : > { %v534_v20 = vadd.f32 %v533_v17, %v469_v18  ;;  %v447_v21 = vpop.f32.mrf.mxu0  ;;  %v512_v22 = vpop.f32.mrf.mxu1 }
 0x133   : > { %v448_v23 = vadd.f32 %v1327_v0, %v447_v21 }
 0x134   : > { %v569_v24 = vadd.f32 %v553_v19, %v534_v20 }
 0x135   : > { %v513_v26 = vadd.f32 %v512_v22, %v448_v23 }
 0x136   : > { %585 = vst [vmem:[%s1334_s11 + $0x70] sm:$0xff] %v569_v24 }
 0x137   : > { %v471_v27 = vpop.f32.mrf.mxu2  ;;  %v562_v28 = vadd.f32 %v546_v25, %v513_v26  ;;  %v536_v29 = vpop.f32.mrf.mxu3 }
 0x138   : > { %v472_v30 = vadd.f32 %v1327_v0, %v471_v27 }
 0x139   : > { %578 = vst [vmem:[%s1334_s11 + $0x38] sm:$0xff] %v562_v28 }
 0x13a   : > { %v537_v32 = vadd.f32 %v536_v29, %v472_v30 }
 0x13c   : > { %v570_v33 = vadd.f32 %v554_v31, %v537_v32 }
 0x13e   : > { %586 = vst [vmem:[%s1334_s11 + $0x78] sm:$0xff] %v570_v33 }
 0x13f   : > { %1035 = shalt.err (!%p1032_p13)
}
 0x140   : > { %s1105_s1 = smov 128   ;;  %s1106_s2 = smov 256  }
 0x141   : > { %s1107_s21 = smov 8  }
 0x142   : > { %807 = dma.vmem_to_hbm [thread:$0]  (%p1225_p0), %s603_s30, 2048, %s605_s18, %s588_s5, %s1105_s1, %s1106_s2, %s1107_s21  }
 0x143 PF: > { %s1448_s26 = sld [smem:[#allocation16_spill]]  ;;  %s619_s10 = sand.u32 1, %s1078_s15  }
 0x144   : > { %p824_p3 = pnand %p747_p4, %p1229_p2  ;;  %s620_s0 = scalar_lea.sflag [#allocation4], %s619_s10 }
 0x146   : > { %p825_p5 = pneg %p824_p3 }
 0x148   : > { %1073 = dma.done.wait (%p825_p5), %s620_s0, 2048  }
 0x149   : > { %1075 = vsyncadd (%p825_p5), %s620_s0, 4294965248  ;;  %s24_s20 = sadd.s32 1, %s1448_s26   ;;  %s1449_s17 = sld [smem:[#allocation15_spill]] }
 0x14a   : > { %p21_p1 = scmp.ge.s32.totalorder %s24_s20, 4   ;;  %s1450_s27 = sld [smem:[#allocation18_spill]] }
 0x14b   : > { %s1451_s24 = sld [smem:[#allocation17_spill]]  ;;  %s1452_s15 = smov %s1082_s16 }
 0x14c   : > { %s1455_s18 = smov %s1094_s19 }
 0x14d   :  { %23 = sbr.rel (!%p21_p1) target bundleno = 13 (0xd), region = 111 }
 0x14f   : > { %s1453_s16 = smov %s1449_s17 }
 0x150   : > { %s1454_s17 = smov %s1450_s27 }
 0x151   : > { %s1456_s19 = smov %s1451_s24 }
 0x152   :  { %626 = vsyncpa [#allocation3], 1 }
 0x153   :  { %628 = vsyncpa [#allocation3 + $0x1], 1 }
 0x154   :  { %629 = vsyncpa [#allocation6], 1 }
 0x155   :  { %631 = vsyncpa [#allocation6 + $0x1], 1 }
 0x156   :  { %632 = vsyncpa [#allocation9], 1 }
 0x157   :  { %634 = vsyncpa [#allocation9 + $0x1], 1 }
 0x158   :  { %635 = vsyncpa [#allocation4], 1 }
 0x159   :  { %637 = vsyncpa [#allocation4 + $0x1], 1 }

</bundles_post_ra>
